<compile_context>
chip_gen: v7x
topology: tpu7x:2x2x1
jax: 0.10.0
libtpu: 0.0.40
codegen_flags: <defaults>
</compile_context>

<pallas_src>
import math
from functools import partial

import jax
import jax.numpy as jnp
from jax.experimental import pallas as pl
from jax.experimental.pallas import tpu as pltpu

_INV_SQRT2 = 1.0 / math.sqrt(2.0)


def _gelu_exact(x):
    # PyTorch nn.GELU() default is the exact (erf-based) formulation.
    # TODO(synk): on v5e, if the kernel is VALU-bound, switch to the tanh
    # approximation (runs on the otherwise-idle EUP slot).
    return 0.5 * x * (1.0 + jax.lax.erf(x * _INV_SQRT2))


def _round_up(x, m):
    return ((x + m - 1) // m) * m


def _round_down(x, m):
    return (x // m) * m


# ---------------------------------------------------------------------------
# Kernel
# ---------------------------------------------------------------------------

def _net_forward(x, w1_ref, w2s_ref, wb_ref, wo_ref, vec_ref):
    """One CrossMapperNet forward on a (TB, in_dim) activation block.

    vec_ref is the packed (8, W) slab with rows:
      0: b1 (h1) | 1: b2||bs (w2s cols) | 2: gamma (h2) | 3: beta (h2)
      4: bb (h1) | 5: bo (out_pack)     | 6,7: zero padding
    wo_ref is zero-padded to a multiple of 128 columns (lane-dense store).
    """
    h1 = w1_ref.shape[1]
    h2 = wb_ref.shape[0]
    out_pack = wo_ref.shape[1]
    w2s_cols = w2s_ref.shape[1]
    has_shortcut = (w2s_cols == 2 * h2)   # static (h1 != h2 case)

    cdt = w1_ref.dtype                    # MXU input dtype (f32 or bf16)

    b1 = vec_ref[0:1, :h1]
    b2s = vec_ref[1:2, :w2s_cols]
    gamma = vec_ref[2:3, :h2]
    beta = vec_ref[3:4, :h2]
    bb = vec_ref[4:5, :h1]
    bo = vec_ref[5:6, :out_pack]

    # x1 = GELU(fc1(x)); dropout -> identity (eval)
    x1 = _gelu_exact(
        jnp.dot(x.astype(cdt), w1_ref[...],
                preferred_element_type=jnp.float32) + b1)

    # Fused fc2 + shortcut: one (TB, h1) @ (h1, 2*h2) matmul, split statically.
    z = jnp.dot(x1.astype(cdt), w2s_ref[...],
                preferred_element_type=jnp.float32) + b2s
    x2 = z[:, :h2]
    x1s = z[:, h2:] if has_shortcut else x1

    # LayerNorm(x2): two-pass (cancellation-safe) variance.
    n = jnp.float32(h2)
    mean = jnp.sum(x2, axis=-1, keepdims=True) / n
    d = x2 - mean
    var = jnp.sum(d * d, axis=-1, keepdims=True) / n
    x2 = d * jax.lax.rsqrt(var + 1e-5) * gamma + beta

    # residual add + relu
    x2 = jnp.maximum(x2 + x1s, 0.0)

    # x3 = relu(bottleneck(x2)); dropout -> identity (eval)
    x3 = jnp.maximum(
        jnp.dot(x2.astype(cdt), wb_ref[...],
                preferred_element_type=jnp.float32) + bb, 0.0)

    # out = sigmoid(output(x3)); padded columns are sigmoid(0)=0.5, sliced off
    # in the wrapper.
    out = jnp.dot(x3.astype(cdt), wo_ref[...],
                  preferred_element_type=jnp.float32) + bo
    return jax.nn.sigmoid(out)


def _cross_mapper_pair_kernel(xr_ref, xf_ref,
                              a_w1, a_w2s, a_wb, a_wo, a_vec,
                              b_w1, b_w2s, b_wb, b_wo, b_vec,
                              pf_ref, pr_ref):
    pf_ref[...] = _net_forward(xr_ref[...], a_w1, a_w2s, a_wb, a_wo,
                               a_vec).astype(pf_ref.dtype)
    pr_ref[...] = _net_forward(xf_ref[...], b_w1, b_w2s, b_wb, b_wo,
                               b_vec).astype(pr_ref.dtype)


# ---------------------------------------------------------------------------
# Wrapper
# ---------------------------------------------------------------------------

def _vmem_capacity_bytes():
    """Physical VMEM per core; conservative 64 MiB (v7x) fallback."""
    try:
        info = pltpu.get_tpu_info()
        cap = getattr(info, "vmem_capacity_bytes", None)
        if cap:
            return int(cap)
    except Exception:
        pass
    return 64 * 1024 * 1024


def _weight_spec(arr):
    """Whole-array, VMEM-resident, single-buffered (constant index map)."""
    nd = arr.ndim
    return pl.BlockSpec(arr.shape, lambda i, _nd=nd: (0,) * _nd,
                        pipeline_mode=pl.Buffered(1))


@jax.jit
def cross_mapper_pair_forward(params, w_r, w_f):
    a = params["r_to_f"]
    b = params["f_to_r"]

    batch, dim_r = w_r.shape
    _, dim_f = w_f.shape

    h1a, h2a, opf = a["w1"].shape[1], a["wb"].shape[0], a["wo"].shape[1]
    h1b, h2b, opr = b["w1"].shape[1], b["wb"].shape[0], b["wo"].shape[1]
    out_f, out_r = dim_f, dim_r          # true (unpadded) output widths

    # --- VMEM budgeting -----------------------------------------------------
    def _nbytes(x):
        return x.size * x.dtype.itemsize

    param_keys = ("w1", "w2s", "wb", "wo", "vec")
    weight_bytes = sum(_nbytes(p[k]) for p in (a, b) for k in param_keys)

    # Per-row f32 activation footprint for BOTH nets (live in one body) plus
    # double-buffered input/output tiles.
    chain_a = 2 * h1a + 3 * h2a + opf
    chain_b = 2 * h1b + 3 * h2b + opr
    per_row_bytes = 4 * (2 * (dim_r + dim_f) + 2 * (opf + opr)
                         + chain_a + chain_b)

    vmem_cap = _vmem_capacity_bytes()
    budget = int(0.55 * vmem_cap)
    avail = max(budget - weight_bytes, 1 << 20)
    tb = max(8, min(1024, _round_down(avail // per_row_bytes, 8)))

    # Guarantee grid >= 2 when batch allows it (feeds both TCs on v7x).
    if batch >= 16 and batch <= tb:
        tb = _round_up(pl.cdiv(batch, 2), 8)
    tb = max(8, min(tb, _round_up(batch, 8)))

    padded = _round_up(batch, tb)
    if padded != batch:
        w_r = jnp.pad(w_r, ((0, padded - batch), (0, 0)))
        w_f = jnp.pad(w_f, ((0, padded - batch), (0, 0)))
    grid = (padded // tb,)

    vmem_limit = int(min(int(0.9 * vmem_cap),
                         max(weight_bytes + tb * per_row_bytes + (8 << 20),
                             32 << 20)))

    # --- pallas_call ---------------------------------------------------------
    operands = (w_r, w_f) + tuple(a[k] for k in param_keys) \
                          + tuple(b[k] for k in param_keys)

    in_specs = ([pl.BlockSpec((tb, dim_r), lambda i: (i, 0)),
                 pl.BlockSpec((tb, dim_f), lambda i: (i, 0))]
                + [_weight_spec(a[k]) for k in param_keys]
                + [_weight_spec(b[k]) for k in param_keys])

    out_specs = (pl.BlockSpec((tb, opf), lambda i: (i, 0)),
                 pl.BlockSpec((tb, opr), lambda i: (i, 0)))

    out_shape = (jax.ShapeDtypeStruct((padded, opf), jnp.float32),
                 jax.ShapeDtypeStruct((padded, opr), jnp.float32))

    pf, pr = pl.pallas_call(
        _cross_mapper_pair_kernel,
        out_shape=out_shape,
        grid=grid,
        in_specs=in_specs,
        out_specs=out_specs,
        compiler_params=pltpu.CompilerParams(
            dimension_semantics=("parallel",),
            vmem_limit_bytes=vmem_limit),
    )(*operands)

    return pf[:batch, :out_f], pr[:batch, :out_r]


# ---------------------------------------------------------------------------
# Parameter initialization (packed layout)
# ---------------------------------------------------------------------------

def _init_linear(key, in_dim, out_dim):
    # Matches torch.nn.Linear default init: U(-1/sqrt(in), 1/sqrt(in)).
    kw, kb = jax.random.split(key)
    bound = 1.0 / math.sqrt(in_dim)
    w = jax.random.uniform(kw, (in_dim, out_dim), jnp.float32, -bound, bound)
    bvec = jax.random.uniform(kb, (out_dim,), jnp.float32, -bound, bound)
    return w, bvec


def _row(v, width):
    v = jnp.asarray(v, jnp.float32).reshape(1, -1)
    return jnp.pad(v, ((0, 0), (0, width - v.shape[1])))


def init_cross_mapper_net(key, input_dim, output_dim, hidden_factor=4,
                          param_dtype=jnp.float32):
    h1 = input_dim * 2
    h2 = input_dim * hidden_factor
    k1, k2, k3, k4, k5 = jax.random.split(key, 5)
    w1, b1 = _init_linear(k1, input_dim, h1)        # fc1
    w2, b2 = _init_linear(k2, h1, h2)               # fc2
    ws, bs = _init_linear(k3, h1, h2)               # shortcut
    wb, bb = _init_linear(k4, h2, h1)               # bottleneck
    wo, bo = _init_linear(k5, h1, output_dim)       # output
    gamma = jnp.ones((h2,), jnp.float32)            # LayerNorm weight
    beta = jnp.zeros((h2,), jnp.float32)            # LayerNorm bias

    if h1 != h2:
        # Shortcut branch active (hidden_factor != 2): fuse fc2 || shortcut.
        w2s = jnp.concatenate([w2, ws], axis=1)     # (h1, 2*h2)
        b2s = jnp.concatenate([b2, bs], axis=0)     # (2*h2,)
    else:
        w2s, b2s = w2, b2                           # shortcut skipped (identity)

    # Pad output projection to a lane-dense multiple of 128 columns.
    out_pack = _round_up(output_dim, 128)
    wo = jnp.pad(wo, ((0, 0), (0, out_pack - output_dim)))

    # Pack all small vectors into one lane-dense (8, W) slab (kept in f32).
    widths = [h1, b2s.shape[0], h2, h2, h1, out_pack]
    wvec = _round_up(max(widths), 128)
    vec = jnp.concatenate(
        [_row(b1, wvec), _row(b2s, wvec), _row(gamma, wvec), _row(beta, wvec),
         _row(bb, wvec), _row(bo, wvec), jnp.zeros((2, wvec), jnp.float32)],
        axis=0)                                     # (8, wvec)

    return dict(w1=w1.astype(param_dtype),
                w2s=w2s.astype(param_dtype),
                wb=wb.astype(param_dtype),
                wo=wo.astype(param_dtype),
                vec=vec)                            # biases / LN stay f32


def init_cross_mapper_pair(key, dim_r, dim_f, param_dtype=jnp.float32):
    k_rf, k_fr = jax.random.split(key)
    return {
        "r_to_f": init_cross_mapper_net(k_rf, dim_r, dim_f,
                                        param_dtype=param_dtype),
        "f_to_r": init_cross_mapper_net(k_fr, dim_f, dim_r,
                                        param_dtype=param_dtype),
    }


# ---------------------------------------------------------------------------
# Pure-JAX reference (for correctness check)
# ---------------------------------------------------------------------------

def _reference_net(x, p, out_dim):
    w1 = p["w1"].astype(jnp.float32)
    w2s = p["w2s"].astype(jnp.float32)
    wb = p["wb"].astype(jnp.float32)
    wo = p["wo"].astype(jnp.float32)
    vec = p["vec"]
    h1 = w1.shape[1]
    h2 = wb.shape[0]
    out_pack = wo.shape[1]
    has_shortcut = (w2s.shape[1] == 2 * h2)

    b1 = vec[0, :h1]
    b2s = vec[1, :w2s.shape[1]]
    gamma = vec[2, :h2]
    beta = vec[3, :h2]
    bb = vec[4, :h1]
    bo = vec[5, :out_pack]

    x1 = _gelu_exact(x @ w1 + b1)
    z = x1 @ w2s + b2s
    x2 = z[:, :h2]
    x1s = z[:, h2:] if has_shortcut else x1
    mean = jnp.mean(x2, axis=-1, keepdims=True)
    var = jnp.mean((x2 - mean) ** 2, axis=-1, keepdims=True)
    x2 = (x2 - mean) * jax.lax.rsqrt(var + 1e-5) * gamma + beta
    x2 = jnp.maximum(x2 + x1s, 0.0)
    x3 = jnp.maximum(x2 @ wb + bb, 0.0)
    return jax.nn.sigmoid(x3 @ wo + bo)[:, :out_dim]


# ---------------------------------------------------------------------------
# Demo
# ---------------------------------------------------------------------------

if __name__ == "__main__":
    key = jax.random.PRNGKey(0)
    k_params, k_r, k_f = jax.random.split(key, 3)

    # batch=20 deliberately not a multiple of the tile -> exercises the
    # padded-batch / grid>=2 path.
    batch, dim_r, dim_f = 20, 16, 32

    w_r = jax.random.normal(k_r, (batch, dim_r), jnp.float32)
    w_f = jax.random.normal(k_f, (batch, dim_f), jnp.float32)

    # ---- f32 weights (numerically closest to PyTorch) ----
    params = init_cross_mapper_pair(k_params, dim_r, dim_f)
    pred_f, pred_r = cross_mapper_pair_forward(params, w_r, w_f)
    jax.block_until_ready((pred_f, pred_r))

    assert pred_f.shape == (batch, dim_f)
    assert pred_r.shape == (batch, dim_r)
    assert bool(jnp.all(jnp.isfinite(pred_f)))
    assert bool(jnp.all(jnp.isfinite(pred_r)))

    ref_f = _reference_net(w_r, params["r_to_f"], dim_f)
    ref_r = _reference_net(w_f, params["f_to_r"], dim_r)
    assert bool(jnp.allclose(pred_f, ref_f, rtol=0.0, atol=5e-3))
    assert bool(jnp.allclose(pred_r, ref_r, rtol=0.0, atol=5e-3))

    # ---- bf16 weight storage (v6e/v7x fast path; f32 accumulate) ----
    params_bf16 = init_cross_mapper_pair(k_params, dim_r, dim_f,
                                         param_dtype=jnp.bfloat16)
    pf16, pr16 = cross_mapper_pair_forward(params_bf16, w_r, w_f)
    jax.block_until_ready((pf16, pr16))
    assert bool(jnp.all(jnp.isfinite(pf16)))
    assert bool(jnp.all(jnp.isfinite(pr16)))
    assert bool(jnp.allclose(pf16, ref_f, rtol=0.0, atol=3e-2))
    assert bool(jnp.allclose(pr16, ref_r, rtol=0.0, atol=3e-2))

    print("KERNEL_OK")
</pallas_src>

<mosaic_0001>
module attributes {stable_mosaic.version = 11 : i64} {
  func.func @_cross_mapper_pair_kernel(%arg0: i32, %arg1: memref<16x16xf32, #tpu.memory_space<vmem>>, %arg2: memref<16x32xf32, #tpu.memory_space<vmem>>, %arg3: memref<16x32xf32, #tpu.memory_space<vmem>>, %arg4: memref<32x128xf32, #tpu.memory_space<vmem>>, %arg5: memref<64x32xf32, #tpu.memory_space<vmem>>, %arg6: memref<32x128xf32, #tpu.memory_space<vmem>>, %arg7: memref<8x128xf32, #tpu.memory_space<vmem>>, %arg8: memref<32x64xf32, #tpu.memory_space<vmem>>, %arg9: memref<64x256xf32, #tpu.memory_space<vmem>>, %arg10: memref<128x64xf32, #tpu.memory_space<vmem>>, %arg11: memref<64x128xf32, #tpu.memory_space<vmem>>, %arg12: memref<8x256xf32, #tpu.memory_space<vmem>>, %arg13: memref<16x128xf32, #tpu.memory_space<vmem>>, %arg14: memref<16x128xf32, #tpu.memory_space<vmem>>) attributes {dimension_semantics = [#tpu.dimension_semantics<parallel>], iteration_bounds = array<i64: 2>, scalar_prefetch = 0 : i64, scratch_operands = 0 : i64, tpu.core_type = #tpu.core_type<tc>, window_params = [{transform_indices = @transform_0, window_bounds = array<i64: 16, 16>}, {transform_indices = @transform_1, window_bounds = array<i64: 16, 32>}, {pipeline_mode = #tpu.pipeline_mode<synchronous>, transform_indices = @transform_2, window_bounds = array<i64: 16, 32>}, {pipeline_mode = #tpu.pipeline_mode<synchronous>, transform_indices = @transform_3, window_bounds = array<i64: 32, 128>}, {pipeline_mode = #tpu.pipeline_mode<synchronous>, transform_indices = @transform_4, window_bounds = array<i64: 64, 32>}, {pipeline_mode = #tpu.pipeline_mode<synchronous>, transform_indices = @transform_5, window_bounds = array<i64: 32, 128>}, {pipeline_mode = #tpu.pipeline_mode<synchronous>, transform_indices = @transform_6, window_bounds = array<i64: 8, 128>}, {pipeline_mode = #tpu.pipeline_mode<synchronous>, transform_indices = @transform_7, window_bounds = array<i64: 32, 64>}, {pipeline_mode = #tpu.pipeline_mode<synchronous>, transform_indices = @transform_8, window_bounds = array<i64: 64, 256>}, {pipeline_mode = #tpu.pipeline_mode<synchronous>, transform_indices = @transform_9, window_bounds = array<i64: 128, 64>}, {pipeline_mode = #tpu.pipeline_mode<synchronous>, transform_indices = @transform_10, window_bounds = array<i64: 64, 128>}, {pipeline_mode = #tpu.pipeline_mode<synchronous>, transform_indices = @transform_11, window_bounds = array<i64: 8, 256>}, {transform_indices = @transform_12, window_bounds = array<i64: 16, 128>}, {transform_indices = @transform_13, window_bounds = array<i64: 16, 128>}]} {
    %c0 = arith.constant 0 : index
    %c0_0 = arith.constant 0 : index
    %0 = vector.load %arg1[%c0, %c0_0] : memref<16x16xf32, #tpu.memory_space<vmem>>, vector<16x16xf32>
    %c0_1 = arith.constant 0 : index
    %c0_2 = arith.constant 0 : index
    %1 = vector.load %arg7[%c0_1, %c0_2] : memref<8x128xf32, #tpu.memory_space<vmem>>, vector<1x32xf32>
    %c1 = arith.constant 1 : index
    %c0_3 = arith.constant 0 : index
    %2 = vector.load %arg7[%c1, %c0_3] : memref<8x128xf32, #tpu.memory_space<vmem>>, vector<1x128xf32>
    %c2 = arith.constant 2 : index
    %c0_4 = arith.constant 0 : index
    %3 = vector.load %arg7[%c2, %c0_4] : memref<8x128xf32, #tpu.memory_space<vmem>>, vector<1x64xf32>
    %c3 = arith.constant 3 : index
    %c0_5 = arith.constant 0 : index
    %4 = vector.load %arg7[%c3, %c0_5] : memref<8x128xf32, #tpu.memory_space<vmem>>, vector<1x64xf32>
    %c4 = arith.constant 4 : index
    %c0_6 = arith.constant 0 : index
    %5 = vector.load %arg7[%c4, %c0_6] : memref<8x128xf32, #tpu.memory_space<vmem>>, vector<1x32xf32>
    %c5 = arith.constant 5 : index
    %c0_7 = arith.constant 0 : index
    %6 = vector.load %arg7[%c5, %c0_7] : memref<8x128xf32, #tpu.memory_space<vmem>>, vector<1x128xf32>
    %c0_8 = arith.constant 0 : index
    %c0_9 = arith.constant 0 : index
    %7 = vector.load %arg3[%c0_8, %c0_9] : memref<16x32xf32, #tpu.memory_space<vmem>>, vector<16x32xf32>
    %cst = arith.constant dense<0.000000e+00> : vector<16x32xf32>
    %8 = tpu.matmul %0, %7, %cst {dimension_numbers = #tpu.dot_dimension_numbers<[1], [0], [0], [1], [0, 0, 1, 1], [], []>} : vector<16x16xf32>, vector<16x32xf32>, vector<16x32xf32> -> vector<16x32xf32>
    %9 = vector.broadcast %1 : vector<1x32xf32> to vector<16x32xf32>
    %10 = arith.addf %8, %9 : vector<16x32xf32>
    %cst_10 = arith.constant 5.000000e-01 : f32
    %11 = vector.broadcast %cst_10 : f32 to vector<16x32xf32>
    %12 = arith.mulf %11, %10 : vector<16x32xf32>
    %cst_11 = arith.constant 0.707106769 : f32
    %13 = vector.broadcast %cst_11 : f32 to vector<16x32xf32>
    %14 = arith.mulf %10, %13 : vector<16x32xf32>
    %15 = math.erf %14 : vector<16x32xf32>
    %cst_12 = arith.constant 1.000000e+00 : f32
    %16 = vector.broadcast %cst_12 : f32 to vector<16x32xf32>
    %17 = arith.addf %16, %15 : vector<16x32xf32>
    %18 = arith.mulf %12, %17 : vector<16x32xf32>
    %c0_13 = arith.constant 0 : index
    %c0_14 = arith.constant 0 : index
    %19 = vector.load %arg4[%c0_13, %c0_14] : memref<32x128xf32, #tpu.memory_space<vmem>>, vector<32x128xf32>
    %cst_15 = arith.constant dense<0.000000e+00> : vector<16x128xf32>
    %20 = tpu.matmul %18, %19, %cst_15 {dimension_numbers = #tpu.dot_dimension_numbers<[1], [0], [0], [1], [0, 0, 1, 1], [], []>} : vector<16x32xf32>, vector<32x128xf32>, vector<16x128xf32> -> vector<16x128xf32>
    %21 = vector.broadcast %2 : vector<1x128xf32> to vector<16x128xf32>
    %22 = arith.addf %20, %21 : vector<16x128xf32>
    %23 = vector.extract_strided_slice %22 {offsets = [0, 0], sizes = [16, 64], strides = [1, 1]} : vector<16x128xf32> to vector<16x64xf32>
    %24 = vector.extract_strided_slice %22 {offsets = [0, 64], sizes = [16, 64], strides = [1, 1]} : vector<16x128xf32> to vector<16x64xf32>
    %cst_16 = arith.constant dense<0.000000e+00> : vector<16xf32>
    %25 = vector.multi_reduction <add>, %23, %cst_16 [1] : vector<16x64xf32> to vector<16xf32>
    %26 = vector.shape_cast %25 : vector<16xf32> to vector<16x1xf32>
    %cst_17 = arith.constant 6.400000e+01 : f32
    %27 = vector.broadcast %cst_17 : f32 to vector<16x1xf32>
    %28 = arith.divf %26, %27 : vector<16x1xf32>
    %29 = vector.broadcast %28 : vector<16x1xf32> to vector<16x64xf32>
    %30 = arith.subf %23, %29 : vector<16x64xf32>
    %31 = arith.mulf %30, %30 : vector<16x64xf32>
    %cst_18 = arith.constant dense<0.000000e+00> : vector<16xf32>
    %32 = vector.multi_reduction <add>, %31, %cst_18 [1] : vector<16x64xf32> to vector<16xf32>
    %33 = vector.shape_cast %32 : vector<16xf32> to vector<16x1xf32>
    %cst_19 = arith.constant 6.400000e+01 : f32
    %34 = vector.broadcast %cst_19 : f32 to vector<16x1xf32>
    %35 = arith.divf %33, %34 : vector<16x1xf32>
    %cst_20 = arith.constant 9.99999974E-6 : f32
    %36 = vector.broadcast %cst_20 : f32 to vector<16x1xf32>
    %37 = arith.addf %35, %36 : vector<16x1xf32>
    %38 = math.rsqrt %37 : vector<16x1xf32>
    %39 = vector.broadcast %38 : vector<16x1xf32> to vector<16x64xf32>
    %40 = arith.mulf %30, %39 : vector<16x64xf32>
    %41 = vector.broadcast %3 : vector<1x64xf32> to vector<16x64xf32>
    %42 = arith.mulf %40, %41 : vector<16x64xf32>
    %43 = vector.broadcast %4 : vector<1x64xf32> to vector<16x64xf32>
    %44 = arith.addf %42, %43 : vector<16x64xf32>
    %45 = arith.addf %44, %24 : vector<16x64xf32>
    %cst_21 = arith.constant 0.000000e+00 : f32
    %46 = vector.broadcast %cst_21 : f32 to vector<16x64xf32>
    %47 = arith.maximumf %45, %46 : vector<16x64xf32>
    %c0_22 = arith.constant 0 : index
    %c0_23 = arith.constant 0 : index
    %48 = vector.load %arg5[%c0_22, %c0_23] : memref<64x32xf32, #tpu.memory_space<vmem>>, vector<64x32xf32>
    %cst_24 = arith.constant dense<0.000000e+00> : vector<16x32xf32>
    %49 = tpu.matmul %47, %48, %cst_24 {dimension_numbers = #tpu.dot_dimension_numbers<[1], [0], [0], [1], [0, 0, 1, 1], [], []>} : vector<16x64xf32>, vector<64x32xf32>, vector<16x32xf32> -> vector<16x32xf32>
    %50 = vector.broadcast %5 : vector<1x32xf32> to vector<16x32xf32>
    %51 = arith.addf %49, %50 : vector<16x32xf32>
    %cst_25 = arith.constant 0.000000e+00 : f32
    %52 = vector.broadcast %cst_25 : f32 to vector<16x32xf32>
    %53 = arith.maximumf %51, %52 : vector<16x32xf32>
    %c0_26 = arith.constant 0 : index
    %c0_27 = arith.constant 0 : index
    %54 = vector.load %arg6[%c0_26, %c0_27] : memref<32x128xf32, #tpu.memory_space<vmem>>, vector<32x128xf32>
    %cst_28 = arith.constant dense<0.000000e+00> : vector<16x128xf32>
    %55 = tpu.matmul %53, %54, %cst_28 {dimension_numbers = #tpu.dot_dimension_numbers<[1], [0], [0], [1], [0, 0, 1, 1], [], []>} : vector<16x32xf32>, vector<32x128xf32>, vector<16x128xf32> -> vector<16x128xf32>
    %56 = vector.broadcast %6 : vector<1x128xf32> to vector<16x128xf32>
    %57 = arith.addf %55, %56 : vector<16x128xf32>
    %58 = arith.negf %57 : vector<16x128xf32>
    %59 = math.exp %58 : vector<16x128xf32>
    %cst_29 = arith.constant 1.000000e+00 : f32
    %60 = vector.broadcast %cst_29 : f32 to vector<16x128xf32>
    %61 = arith.addf %60, %59 : vector<16x128xf32>
    %62 = arith.divf %60, %61 : vector<16x128xf32>
    %c0_30 = arith.constant 0 : index
    %c0_31 = arith.constant 0 : index
    %63 = vector.load %arg13[%c0_30, %c0_31] : memref<16x128xf32, #tpu.memory_space<vmem>>, vector<16x128xf32>
    tpu.vector_store %arg13[%c0_30, %c0_31], %62 {strides = array<i32>} : memref<16x128xf32, #tpu.memory_space<vmem>>, vector<16x128xf32>,
    %c0_32 = arith.constant 0 : index
    %c0_33 = arith.constant 0 : index
    %64 = vector.load %arg2[%c0_32, %c0_33] : memref<16x32xf32, #tpu.memory_space<vmem>>, vector<16x32xf32>
    %c0_34 = arith.constant 0 : index
    %c0_35 = arith.constant 0 : index
    %65 = vector.load %arg12[%c0_34, %c0_35] : memref<8x256xf32, #tpu.memory_space<vmem>>, vector<1x64xf32>
    %c1_36 = arith.constant 1 : index
    %c0_37 = arith.constant 0 : index
    %66 = vector.load %arg12[%c1_36, %c0_37] : memref<8x256xf32, #tpu.memory_space<vmem>>, vector<1x256xf32>
    %c2_38 = arith.constant 2 : index
    %c0_39 = arith.constant 0 : index
    %67 = vector.load %arg12[%c2_38, %c0_39] : memref<8x256xf32, #tpu.memory_space<vmem>>, vector<1x128xf32>
    %c3_40 = arith.constant 3 : index
    %c0_41 = arith.constant 0 : index
    %68 = vector.load %arg12[%c3_40, %c0_41] : memref<8x256xf32, #tpu.memory_space<vmem>>, vector<1x128xf32>
    %c4_42 = arith.constant 4 : index
    %c0_43 = arith.constant 0 : index
    %69 = vector.load %arg12[%c4_42, %c0_43] : memref<8x256xf32, #tpu.memory_space<vmem>>, vector<1x64xf32>
    %c5_44 = arith.constant 5 : index
    %c0_45 = arith.constant 0 : index
    %70 = vector.load %arg12[%c5_44, %c0_45] : memref<8x256xf32, #tpu.memory_space<vmem>>, vector<1x128xf32>
    %c0_46 = arith.constant 0 : index
    %c0_47 = arith.constant 0 : index
    %71 = vector.load %arg8[%c0_46, %c0_47] : memref<32x64xf32, #tpu.memory_space<vmem>>, vector<32x64xf32>
    %cst_48 = arith.constant dense<0.000000e+00> : vector<16x64xf32>
    %72 = tpu.matmul %64, %71, %cst_48 {dimension_numbers = #tpu.dot_dimension_numbers<[1], [0], [0], [1], [0, 0, 1, 1], [], []>} : vector<16x32xf32>, vector<32x64xf32>, vector<16x64xf32> -> vector<16x64xf32>
    %73 = vector.broadcast %65 : vector<1x64xf32> to vector<16x64xf32>
    %74 = arith.addf %72, %73 : vector<16x64xf32>
    %cst_49 = arith.constant 5.000000e-01 : f32
    %75 = vector.broadcast %cst_49 : f32 to vector<16x64xf32>
    %76 = arith.mulf %75, %74 : vector<16x64xf32>
    %cst_50 = arith.constant 0.707106769 : f32
    %77 = vector.broadcast %cst_50 : f32 to vector<16x64xf32>
    %78 = arith.mulf %74, %77 : vector<16x64xf32>
    %79 = math.erf %78 : vector<16x64xf32>
    %cst_51 = arith.constant 1.000000e+00 : f32
    %80 = vector.broadcast %cst_51 : f32 to vector<16x64xf32>
    %81 = arith.addf %80, %79 : vector<16x64xf32>
    %82 = arith.mulf %76, %81 : vector<16x64xf32>
    %c0_52 = arith.constant 0 : index
    %c0_53 = arith.constant 0 : index
    %83 = vector.load %arg9[%c0_52, %c0_53] : memref<64x256xf32, #tpu.memory_space<vmem>>, vector<64x256xf32>
    %cst_54 = arith.constant dense<0.000000e+00> : vector<16x256xf32>
    %84 = tpu.matmul %82, %83, %cst_54 {dimension_numbers = #tpu.dot_dimension_numbers<[1], [0], [0], [1], [0, 0, 1, 1], [], []>} : vector<16x64xf32>, vector<64x256xf32>, vector<16x256xf32> -> vector<16x256xf32>
    %85 = vector.broadcast %66 : vector<1x256xf32> to vector<16x256xf32>
    %86 = arith.addf %84, %85 : vector<16x256xf32>
    %87 = vector.extract_strided_slice %86 {offsets = [0, 0], sizes = [16, 128], strides = [1, 1]} : vector<16x256xf32> to vector<16x128xf32>
    %88 = vector.extract_strided_slice %86 {offsets = [0, 128], sizes = [16, 128], strides = [1, 1]} : vector<16x256xf32> to vector<16x128xf32>
    %cst_55 = arith.constant dense<0.000000e+00> : vector<16xf32>
    %89 = vector.multi_reduction <add>, %87, %cst_55 [1] : vector<16x128xf32> to vector<16xf32>
    %90 = vector.shape_cast %89 : vector<16xf32> to vector<16x1xf32>
    %cst_56 = arith.constant 1.280000e+02 : f32
    %91 = vector.broadcast %cst_56 : f32 to vector<16x1xf32>
    %92 = arith.divf %90, %91 : vector<16x1xf32>
    %93 = vector.broadcast %92 : vector<16x1xf32> to vector<16x128xf32>
    %94 = arith.subf %87, %93 : vector<16x128xf32>
    %95 = arith.mulf %94, %94 : vector<16x128xf32>
    %cst_57 = arith.constant dense<0.000000e+00> : vector<16xf32>
    %96 = vector.multi_reduction <add>, %95, %cst_57 [1] : vector<16x128xf32> to vector<16xf32>
    %97 = vector.shape_cast %96 : vector<16xf32> to vector<16x1xf32>
    %cst_58 = arith.constant 1.280000e+02 : f32
    %98 = vector.broadcast %cst_58 : f32 to vector<16x1xf32>
    %99 = arith.divf %97, %98 : vector<16x1xf32>
    %cst_59 = arith.constant 9.99999974E-6 : f32
    %100 = vector.broadcast %cst_59 : f32 to vector<16x1xf32>
    %101 = arith.addf %99, %100 : vector<16x1xf32>
    %102 = math.rsqrt %101 : vector<16x1xf32>
    %103 = vector.broadcast %102 : vector<16x1xf32> to vector<16x128xf32>
    %104 = arith.mulf %94, %103 : vector<16x128xf32>
    %105 = vector.broadcast %67 : vector<1x128xf32> to vector<16x128xf32>
    %106 = arith.mulf %104, %105 : vector<16x128xf32>
    %107 = vector.broadcast %68 : vector<1x128xf32> to vector<16x128xf32>
    %108 = arith.addf %106, %107 : vector<16x128xf32>
    %109 = arith.addf %108, %88 : vector<16x128xf32>
    %cst_60 = arith.constant 0.000000e+00 : f32
    %110 = vector.broadcast %cst_60 : f32 to vector<16x128xf32>
    %111 = arith.maximumf %109, %110 : vector<16x128xf32>
    %c0_61 = arith.constant 0 : index
    %c0_62 = arith.constant 0 : index
    %112 = vector.load %arg10[%c0_61, %c0_62] : memref<128x64xf32, #tpu.memory_space<vmem>>, vector<128x64xf32>
    %cst_63 = arith.constant dense<0.000000e+00> : vector<16x64xf32>
    %113 = tpu.matmul %111, %112, %cst_63 {dimension_numbers = #tpu.dot_dimension_numbers<[1], [0], [0], [1], [0, 0, 1, 1], [], []>} : vector<16x128xf32>, vector<128x64xf32>, vector<16x64xf32> -> vector<16x64xf32>
    %114 = vector.broadcast %69 : vector<1x64xf32> to vector<16x64xf32>
    %115 = arith.addf %113, %114 : vector<16x64xf32>
    %cst_64 = arith.constant 0.000000e+00 : f32
    %116 = vector.broadcast %cst_64 : f32 to vector<16x64xf32>
    %117 = arith.maximumf %115, %116 : vector<16x64xf32>
    %c0_65 = arith.constant 0 : index
    %c0_66 = arith.constant 0 : index
    %118 = vector.load %arg11[%c0_65, %c0_66] : memref<64x128xf32, #tpu.memory_space<vmem>>, vector<64x128xf32>
    %cst_67 = arith.constant dense<0.000000e+00> : vector<16x128xf32>
    %119 = tpu.matmul %117, %118, %cst_67 {dimension_numbers = #tpu.dot_dimension_numbers<[1], [0], [0], [1], [0, 0, 1, 1], [], []>} : vector<16x64xf32>, vector<64x128xf32>, vector<16x128xf32> -> vector<16x128xf32>
    %120 = vector.broadcast %70 : vector<1x128xf32> to vector<16x128xf32>
    %121 = arith.addf %119, %120 : vector<16x128xf32>
    %122 = arith.negf %121 : vector<16x128xf32>
    %123 = math.exp %122 : vector<16x128xf32>
    %cst_68 = arith.constant 1.000000e+00 : f32
    %124 = vector.broadcast %cst_68 : f32 to vector<16x128xf32>
    %125 = arith.addf %124, %123 : vector<16x128xf32>
    %126 = arith.divf %124, %125 : vector<16x128xf32>
    %c0_69 = arith.constant 0 : index
    %c0_70 = arith.constant 0 : index
    %127 = vector.load %arg14[%c0_69, %c0_70] : memref<16x128xf32, #tpu.memory_space<vmem>>, vector<16x128xf32>
    tpu.vector_store %arg14[%c0_69, %c0_70], %126 {strides = array<i32>} : memref<16x128xf32, #tpu.memory_space<vmem>>, vector<16x128xf32>,
    return
  }
  func.func @transform_0(%arg0: i32) -> (i32, i32) {
    %c0_i32 = arith.constant 0 : i32
    %c0_i32_0 = arith.constant 0 : i32
    return %arg0, %c0_i32 : i32, i32
  }
  func.func @transform_1(%arg0: i32) -> (i32, i32) {
    %c0_i32 = arith.constant 0 : i32
    %c0_i32_0 = arith.constant 0 : i32
    return %arg0, %c0_i32 : i32, i32
  }
  func.func @transform_2(%arg0: i32) -> (i32, i32) {
    %c0_i32 = arith.constant 0 : i32
    %c0_i32_0 = arith.constant 0 : i32
    %c0_i32_1 = arith.constant 0 : i32
    return %c0_i32, %c0_i32_0 : i32, i32
  }
  func.func @transform_3(%arg0: i32) -> (i32, i32) {
    %c0_i32 = arith.constant 0 : i32
    %c0_i32_0 = arith.constant 0 : i32
    %c0_i32_1 = arith.constant 0 : i32
    return %c0_i32, %c0_i32_0 : i32, i32
  }
  func.func @transform_4(%arg0: i32) -> (i32, i32) {
    %c0_i32 = arith.constant 0 : i32
    %c0_i32_0 = arith.constant 0 : i32
    %c0_i32_1 = arith.constant 0 : i32
    return %c0_i32, %c0_i32_0 : i32, i32
  }
  func.func @transform_5(%arg0: i32) -> (i32, i32) {
    %c0_i32 = arith.constant 0 : i32
    %c0_i32_0 = arith.constant 0 : i32
    %c0_i32_1 = arith.constant 0 : i32
    return %c0_i32, %c0_i32_0 : i32, i32
  }
  func.func @transform_6(%arg0: i32) -> (i32, i32) {
    %c0_i32 = arith.constant 0 : i32
    %c0_i32_0 = arith.constant 0 : i32
    %c0_i32_1 = arith.constant 0 : i32
    return %c0_i32, %c0_i32_0 : i32, i32
  }
  func.func @transform_7(%arg0: i32) -> (i32, i32) {
    %c0_i32 = arith.constant 0 : i32
    %c0_i32_0 = arith.constant 0 : i32
    %c0_i32_1 = arith.constant 0 : i32
    return %c0_i32, %c0_i32_0 : i32, i32
  }
  func.func @transform_8(%arg0: i32) -> (i32, i32) {
    %c0_i32 = arith.constant 0 : i32
    %c0_i32_0 = arith.constant 0 : i32
    %c0_i32_1 = arith.constant 0 : i32
    return %c0_i32, %c0_i32_0 : i32, i32
  }
  func.func @transform_9(%arg0: i32) -> (i32, i32) {
    %c0_i32 = arith.constant 0 : i32
    %c0_i32_0 = arith.constant 0 : i32
    %c0_i32_1 = arith.constant 0 : i32
    return %c0_i32, %c0_i32_0 : i32, i32
  }
  func.func @transform_10(%arg0: i32) -> (i32, i32) {
    %c0_i32 = arith.constant 0 : i32
    %c0_i32_0 = arith.constant 0 : i32
    %c0_i32_1 = arith.constant 0 : i32
    return %c0_i32, %c0_i32_0 : i32, i32
  }
  func.func @transform_11(%arg0: i32) -> (i32, i32) {
    %c0_i32 = arith.constant 0 : i32
    %c0_i32_0 = arith.constant 0 : i32
    %c0_i32_1 = arith.constant 0 : i32
    return %c0_i32, %c0_i32_0 : i32, i32
  }
  func.func @transform_12(%arg0: i32) -> (i32, i32) {
    %c0_i32 = arith.constant 0 : i32
    %c0_i32_0 = arith.constant 0 : i32
    return %arg0, %c0_i32 : i32, i32
  }
  func.func @transform_13(%arg0: i32) -> (i32, i32) {
    %c0_i32 = arith.constant 0 : i32
    %c0_i32_0 = arith.constant 0 : i32
    return %arg0, %c0_i32 : i32, i32
  }
}

</mosaic_0001>

<bundles_post_ra>
// kernel: cross_mapper_pair_forward.1
= control target key start
LH: loop header
LB: loop body
LE: loop exit
PB: predicated region body
PF: predicated region fallthrough
CT: control target
= control target key end

     0   :  { %s1912_s25 = smov 0   ;;  %s2203_s0 = inlined_call_operand.vmem [shape: f32[32,16], index: 0, kind: input, shape index: {}]   ;;  %s2204_s1 = inlined_call_operand.vmem [shape: f32[32,32], index: 1, kind: input, shape index: {}]   ;;  %s2205_s2 = inlined_call_operand.vmem [shape: f32[16,32], index: 2, kind: input, shape index: {}]   ;;  %s2206_s3 = inlined_call_operand.vmem [shape: f32[32,128], index: 3, kind: input, shape index: {}]   ;;  %s2207_s4 = inlined_call_operand.vmem [shape: f32[64,32], index: 4, kind: input, shape index: {}]   ;;  %s2208_s5 = inlined_call_operand.vmem [shape: f32[32,128], index: 5, kind: input, shape index: {}]   ;;  %s2209_s6 = inlined_call_operand.vmem [shape: f32[8,128], index: 6, kind: input, shape index: {}]   ;;  %s2210_s7 = inlined_call_operand.vmem [shape: f32[32,64], index: 7, kind: input, shape index: {}]   ;;  %s2211_s8 = inlined_call_operand.vmem [shape: f32[64,256], index: 8, kind: input, shape index: {}]   ;;  %s2212_s9 = inlined_call_operand.vmem [shape: f32[128,64], index: 9, kind: input, shape index: {}]   ;;  %s2213_s10 = inlined_call_operand.vmem [shape: f32[64,128], index: 10, kind: input, shape index: {}]   ;;  %s2214_s11 = inlined_call_operand.vmem [shape: f32[8,256], index: 11, kind: input, shape index: {}]   ;;  %s2215_s12 = inlined_call_operand.vmem [shape: f32[32,128], index: 12, kind: output, shape index: {0}]   ;;  %s2216_s13 = inlined_call_operand.vmem [shape: f32[32,128], index: 13, kind: output, shape index: {1}]  }
   0x1 LB: > { %s1469_s26 = sadd.s32 4294967295, %s1838_s25   ;;  %p1473_p0 = scmp.ge.s32.totalorder %s1838_s25, 1  ;;  %s1838_s25 = sphi %s1912_s25, %s24_s25  }
   0x2   : > { %p402_p1 = scmp.lt.s32.totalorder %s1838_s25, 3 }
   0x4   : > { %p403_p2 = pnand %p1473_p0, %p402_p1 }
   0x5   : > { %v488_v0 = vld [vmem:[%s2205_s2] sm:$0xff] (!%p403_p2)  ;;  %v489_v1 = vld [vmem:[%s2205_s2 + $0x8] sm:$0xff] (!%p403_p2)  ;;  %s1474_s14 = sshll.u32 (!%p403_p2), %s1469_s26, 1  ;;  %vm494_vm0 = vcmask (!%p403_p2), 130048   ;;  %v588_v8 = vld [vmem:[%s2206_s3 + $0x10] sm:$0xff] (!%p403_p2)  ;;  %vm594_vm1 = vcmask (!%p403_p2), 261120  }
   0x6   : > { %406 = sbr.rel (%p403_p2) target bundleno = 2244 (0x8c4), region = 68  ;;  %v1682_v2 = vpack.c.bf16 (!%p403_p2), %v489_v1, %v488_v0  ;;  %p457_p3 = scmp.lt.s32.totalorder (!%p403_p2), %s1474_s14, 3  ;;  %v586_v5 = vld [vmem:[%s2206_s3] sm:$0xff] (!%p403_p2)  ;;  %v587_v6 = vld [vmem:[%s2206_s3 + $0x8] sm:$0xff] (!%p403_p2)  ;;  %v589_v9 = vld [vmem:[%s2206_s3 + $0x18] sm:$0xff] (!%p403_p2)  ;;  %vm676_vm2 = vcmask (!%p403_p2), 523264  }
   0x7   : > { %v1686_v7 = vpack.c.bf16 (!%p403_p2), %v587_v6, %v586_v5  ;;  %v1690_v10 = vpack.c.bf16 (!%p403_p2), %v589_v9, %v588_v8  ;;  %v1482_v11 = vld [vmem:[%s2209_s6] ss:$0 sm:$0xff] (!%p403_p2)  ;;  %v1485_v26 = vld [vmem:[%s2209_s6 + $0x1] ss:$0 sm:$0xff] (!%p403_p2)  ;;  %s1840_s16 = smov (!%p403_p2), 64   ;;  %v729_v44 = vld [vmem:[%s2207_s4 + $0x8] sm:$0xff] (!%p403_p2) }
   0x8   : > { %1683 = vmatprep.subr.bf16.mxu0 (!%p403_p2), %v1682_v2  ;;  %v728_v43 = vld [vmem:[%s2207_s4] sm:$0xff] (!%p403_p2)  ;;  %v730_v46 = vld [vmem:[%s2207_s4 + $0x10] sm:$0xff] (!%p403_p2)  ;;  %v731_v47 = vld [vmem:[%s2207_s4 + $0x18] sm:$0xff] (!%p403_p2) }
   0x9   : > { %1685 = vmatpush3.bf16.msra.mxu0 (!%p403_p2), %v1682_v2  ;;  %1687 = vmatprep.subr.bf16.mxu1 (!%p403_p2), %v1686_v7  ;;  %v1694_v45 = vpack.c.bf16 (!%p403_p2), %v729_v44, %v728_v43  ;;  %v1698_v48 = vpack.c.bf16 (!%p403_p2), %v731_v47, %v730_v46  ;;  %v732_v49 = vld [vmem:[%s2207_s4 + $0x20] sm:$0xff] (!%p403_p2)  ;;  %v733_v50 = vld [vmem:[%s2207_s4 + $0x28] sm:$0xff] (!%p403_p2)  ;;  %v734_v52 = vld [vmem:[%s2207_s4 + $0x30] sm:$0xff] (!%p403_p2) }
   0xa   : > { %1689 = vmatpush3.bf16.msra.mxu1 (!%p403_p2), %v1686_v7  ;;  %v1702_v51 = vpack.c.bf16 (!%p403_p2), %v733_v50, %v732_v49  ;;  %v735_v53 = vld [vmem:[%s2207_s4 + $0x38] sm:$0xff] (!%p403_p2)  ;;  %v823_v55 = vld [vmem:[%s2208_s5] sm:$0xff] (!%p403_p2)  ;;  %v824_v56 = vld [vmem:[%s2208_s5 + $0x8] sm:$0xff] (!%p403_p2) }
   0xb   : > { %1691 = vmatprep.subr.bf16.mxu1 (!%p403_p2), %v1690_v10  ;;  %1695 = vmatprep.subr.bf16.mxu0 (!%p403_p2), %v1694_v45  ;;  %v1706_v54 = vpack.c.bf16 (!%p403_p2), %v735_v53, %v734_v52  ;;  %v1710_v57 = vpack.c.bf16 (!%p403_p2), %v824_v56, %v823_v55  ;;  %v1488_v1 = vld [vmem:[%s2209_s6 + $0x2] ss:$0 sm:$0xff] (!%p403_p2)  ;;  %v1036_v44 = vld [vmem:[%s2211_s8 + $0x30] sm:$0xff] (!%p403_p2)  ;;  %v1039_v46 = vld [vmem:[%s2211_s8 + $0x48] sm:$0xff] (!%p403_p2) }
   0xc   : > { %v1034_v43 = vld [vmem:[%s2211_s8 + $0x20] sm:$0xff] (!%p403_p2)  ;;  %v1041_v47 = vld [vmem:[%s2211_s8 + $0x58] sm:$0xff] (!%p403_p2)  ;;  %v1040_v50 = vld [vmem:[%s2211_s8 + $0x50] sm:$0xff] (!%p403_p2) }
   0xd   : > { %s2218_s14 = smov (!%p457_p3, %s1474_s14), 3  ;;  %v1038_v49 = vld [vmem:[%s2211_s8 + $0x40] sm:$0xff]  ;;  %v1043_v52 = vld [vmem:[%s2211_s8 + $0x68] sm:$0xff]  ;;  %v1045_v53 = vld [vmem:[%s2211_s8 + $0x78] sm:$0xff] }
   0xe   : > { %s1926_s15 = sshll.u32 %s2218_s14, 3  ;;  %1693 = vmatpush3.bf16.msra.mxu1 %v1690_v10  ;;  %v1042_v55 = vld [vmem:[%s2211_s8 + $0x60] sm:$0xff]  ;;  %v1044_v56 = vld [vmem:[%s2211_s8 + $0x70] sm:$0xff] }
   0xf   : > { %s460_s18 = scalar_lea.vmem %s2203_s0, %s1926_s15  ;;  %1711 = vmatprep.subr.bf16.mxu1 %v1710_v57  ;;  %s466_s28 = scalar_lea.vmem %s2204_s1, %s1926_s15 }
  0x10   : > { %v480_v3 = vld [vmem:[%s460_s18] sm:$0xff]  ;;  %v481_v4 = vld [vmem:[%s460_s18 + $0x8] sm:$0xff]  ;;  %s472_s21 = scalar_lea.vmem %s2215_s12, %s1926_s15  ;;  %s478_s22 = scalar_lea.vmem %s2216_s13, %s1926_s15 }
  0x11   : > { %1573 = vmatprep.mubr.msk.f32.mxu0 %vm494_vm0, %v480_v3  ;;  %v1489_v3 = vld [vmem:[%s2209_s6 + $0x3] ss:$0 sm:$0xff] }
  0x12   : > { %1574 = vmatmul.mubr.msk.f32.vlgmr.msra.gmra.mrb[0].mxu0 %vm494_vm0, %v481_v4 }
  0x13   : > { %1697 = vmatpush3.bf16.msra.mxu0 %v1694_v45  ;;  %v1732_v45 = vpack.c.bf16 %v1036_v44, %v1034_v43 }
  0x14   : > { %1699 = vmatprep.subr.bf16.mxu0 %v1698_v48 }
  0x17   : > { %1701 = vmatpush3.bf16.msra.mxu0 %v1698_v48  ;;  %v1734_v48 = vpack.c.bf16 %v1041_v47, %v1039_v46  ;;  %v1174_v46 = vld [vmem:[%s2212_s9 + $0x18] sm:$0xff] }
  0x18   : > { %1703 = vmatprep.subr.bf16.mxu0 %v1702_v51 }
  0x1b   : > { %1705 = vmatpush3.bf16.msra.mxu0 %v1702_v51  ;;  %v1736_v51 = vpack.c.bf16 %v1040_v50, %v1038_v49  ;;  %v1176_v49 = vld [vmem:[%s2212_s9 + $0x28] sm:$0xff] }
  0x1c   : > { %1707 = vmatprep.subr.bf16.mxu0 %v1706_v54 }
  0x1f   : > { %1709 = vmatpush3.bf16.msra.mxu0 %v1706_v54  ;;  %v1738_v54 = vpack.c.bf16 %v1045_v53, %v1043_v52  ;;  %v1178_v52 = vld [vmem:[%s2212_s9 + $0x38] sm:$0xff] }
  0xe5   : > { %v1575_v12 = vpop.f32.mrb[0].mxu0 }
  0xe6   : > { %v573_v13 = vadd.f32 %v1575_v12, %v1482_v11  ;;  %v567_v14 = vpop.f32.mrb[1].mxu0 }
  0xe7   : > { %v568_v15 = vadd.f32 %v1482_v11, %v567_v14 }
  0xe8   : > { %v579_v16 = vmul.f32 0.70710677, %v573_v13  ;;  %v577_v23 = vmul.f32 0.5, %v573_v13 }
  0xe9   : > { %v578_v17 = vmul.f32 0.70710677, %v568_v15  ;;  %v576_v21 = vmul.f32 0.5, %v568_v15 }
  0xea   : > { %1800 = verf.f32 %v579_v16  ;;  %v825_v16 = vld [vmem:[%s2208_s5 + $0x10] sm:$0xff] }
  0xeb   : > { %1802 = verf.f32 %v578_v17  ;;  %v826_v17 = vld [vmem:[%s2208_s5 + $0x18] sm:$0xff] }
  0xf4   : > { %v1801_v18 = vpop.eup %1800 }
  0xf5   : > { %v1803_v19 = vpop.eup %1802  ;;  %v583_v20 = vadd.f32 1.0, %v1801_v18  ;;  %v1714_v18 = vpack.c.bf16 %v826_v17, %v825_v16 }
  0xf6   : > { %v582_v22 = vadd.f32 1.0, %v1803_v19  ;;  %v935_v19 = vld [vmem:[%s2210_s7] sm:$0xff] }
  0xf7   : > { %v585_v25 = vmul.f32 %v583_v20, %v577_v23  ;;  %v936_v20 = vld [vmem:[%s2210_s7 + $0x8] sm:$0xff] }
  0xf8   : > { %v584_v24 = vmul.f32 %v582_v22, %v576_v21  ;;  %v1718_v21 = vpack.c.bf16 %v936_v20, %v935_v19  ;;  %v1490_v22 = vld [vmem:[%s2209_s6 + $0x4] ss:$0 sm:$0xff] }
  0xfa   : > { %1584 = vmatprep.mubr.msk.f32.mxu1 %vm594_vm1, %v584_v24 }
  0xfb   : > { %1585 = vmatmul.mubr.msk.f32.vlgmr.msra.gmra.mrb[0].mxu1 %vm594_vm1, %v585_v25 }
  0xfc   : > { %1713 = vmatpush3.bf16.msra.mxu1 %v1710_v57  ;;  %v1740_v57 = vpack.c.bf16 %v1044_v56, %v1042_v55  ;;  %v1180_v55 = vld [vmem:[%s2212_s9 + $0x48] sm:$0xff] }
  0xfd   : > { %1715 = vmatprep.subr.bf16.mxu1 %v1714_v18 }
 0x100   : > { %1717 = vmatpush3.bf16.msra.mxu1 %v1714_v18 }
 0x101   : > { %1719 = vmatprep.subr.bf16.mxu1 %v1718_v21 }
 0x1ce   : > { %v1586_v27 = vpop.f32.mrb[0].mxu1 }
 0x1cf   : > { %v667_v28 = vpop.f32.mrb[1].mxu1  ;;  %v673_v30 = vadd.f32 %v1586_v27, %v1485_v26  ;;  %v937_v27 = vld [vmem:[%s2210_s7 + $0x10] sm:$0xff] }
 0x1d0   : > { %v668_v29 = vadd.f32 %v1485_v26, %v667_v28  ;;  %v938_v28 = vld [vmem:[%s2210_s7 + $0x18] sm:$0xff] }
 0x1d1   : > { %v680_v32 = vsel %vm676_vm2, %v673_v30, 0.0 }
 0x1d2   : > { %v677_v31 = vsel %vm676_vm2, %v668_v29, 0.0 }
 0x1d3   : > { %678 = vadd.xlane.f32.xlu0 %v677_v31  ;;  %v1722_v31 = vpack.c.bf16 %v938_v28, %v937_v27 }
 0x1d7   : > { %681 = vadd.xlane.f32.xlu0 %v680_v32  ;;  %v926_v32 = vld [vmem:[%s466_s28] sm:$0xff] }
 0x1ed   : > { %718 = vrot.lane.b32.xlu0 %v668_v29, %s1840_s16 }
 0x260   : > { %v679_v33 = vpop.xlane.xlu0 %678 }
 0x261   : > { %v684_v34 = vmul.f32 0.015625, %v679_v33  ;;  %v927_v33 = vld [vmem:[%s466_s28 + $0x8] sm:$0xff] }
 0x263   : > { %v686_v37 = vsub.f32 %v668_v29, %v684_v34  ;;  %v1031_v34 = vld [vmem:[%s2211_s8 + $0x8] sm:$0xff] }
 0x264   : > { %v682_v35 = vpop.xlane.xlu0 %681 }
 0x265   : > { %v685_v36 = vmul.f32 0.015625, %v682_v35  ;;  %v688_v41 = vmul.f32 %v686_v37, %v686_v37  ;;  %v1033_v35 = vld [vmem:[%s2211_s8 + $0x18] sm:$0xff] }
 0x267   : > { %v687_v38 = vsub.f32 %v673_v30, %v685_v36  ;;  %v690_v42 = vsel %vm676_vm2, %v688_v41, 0.0  ;;  %v1726_v36 = vpack.c.bf16 %v1033_v35, %v1031_v34  ;;  %v1037_v41 = vld [vmem:[%s2211_s8 + $0x38] sm:$0xff]  ;;  %v1171_v34 = vld [vmem:[%s2212_s9] sm:$0xff]  ;;  %v1172_v35 = vld [vmem:[%s2212_s9 + $0x8] sm:$0xff] }
 0x268   : > { %v719_v11 = vpop.permute.xlu0 %718 }
 0x269   : > { %v689_v39 = vmul.f32 %v687_v38, %v687_v38  ;;  %1727 = vmatprep.subr.bf16.mxu0 %v1726_v36  ;;  %v1742_v36 = vpack.c.bf16 %v1172_v35, %v1171_v34 }
 0x26b   : > { %v693_v40 = vsel %vm676_vm2, %v689_v39, 0.0 }
 0x26c   : > { %694 = vadd.xlane.f32.xlu1 %v693_v40  ;;  %v1035_v40 = vld [vmem:[%s2211_s8 + $0x28] sm:$0xff] }
 0x270   : > { %691 = vadd.xlane.f32.xlu1 %v690_v42  ;;  %v1730_v42 = vpack.c.bf16 %v1037_v41, %v1035_v40 }
 0x281   : > { %720 = vrot.lane.b32.xlu1 %v673_v30, %s1840_s16 }
 0x2f9   : > { %v695_v58 = vpop.xlane.xlu1 %694 }
 0x2fa   : > { %v697_v59 = vmul.f32 0.015625, %v695_v58  ;;  %v1841_v58 = vmov 0.0  }
 0x2fc   : > { %v699_v60 = vadd.f32 1e-05, %v697_v59  ;;  %v1493_v59 = vld [vmem:[%s2209_s6 + $0x5] ss:$0 sm:$0xff] }
 0x2fd   : > { %v692_v61 = vpop.xlane.xlu1 %691 }
 0x2fe   : > { %1804 = vrsqrt.f32 %v699_v60  ;;  %v696_v62 = vmul.f32 0.015625, %v692_v61 }
 0x300   : > { %v698_v63 = vadd.f32 1e-05, %v696_v62 }
 0x301   : > { %v721_v10 = vpop.permute.xlu1 %720 }
 0x302   : > { %1806 = vrsqrt.f32 %v698_v63 }
 0x308   : > { %v1805_v0 = vpop.eup %1804 }
 0x309   : > { %v703_v2 = vmul.f32 %v1805_v0, %v687_v38  ;;  %v1032_v38 = vld [vmem:[%s2211_s8 + $0x10] sm:$0xff] }
 0x30b   : > { %v709_v4 = vmul.f32 %v1488_v1, %v703_v2  ;;  %v928_v2 = vld [vmem:[%s2214_s11] ss:$0 sm:$0xff] }
 0x30c   : > { %v1807_v5 = vpop.eup %1806 }
 0x30d   : > { %v702_v6 = vmul.f32 %v1807_v5, %v686_v37  ;;  %v715_v7 = vadd.f32 %v1489_v3, %v709_v4  ;;  %v1030_v37 = vld [vmem:[%s2211_s8] sm:$0xff] }
 0x30e   : > { %v1728_v39 = vpack.c.bf16 %v1032_v38, %v1030_v37 }
 0x30f   : > { %v708_v8 = vmul.f32 %v1488_v1, %v702_v6  ;;  %v725_v12 = vadd.f32 %v721_v10, %v715_v7 }
 0x311   : > { %v714_v9 = vadd.f32 %v1489_v3, %v708_v8  ;;  %v727_v15 = vmax.f32 %v725_v12, 0.0 }
 0x313   : > { %v724_v13 = vadd.f32 %v719_v11, %v714_v9 }
 0x315   : > { %v726_v14 = vmax.f32 %v724_v13, 0.0 }
 0x317   : > { %1603 = vmatprep.mubr.msk.f32.mxu0 %vm676_vm2, %v726_v14 }
 0x318   : > { %1604 = vmatmul.mubr.msk.f32.vlgmr.msra.gmra.mrb[2].mxu0 %vm676_vm2, %v727_v15 }
 0x319   : > { %1729 = vmatpush1.bf16.msra.mxu0 %v1728_v39  ;;  %1127 = vmatprep.mubr.f32.mxu0 %v1841_v58 }
 0x31a   : > { %1731 = vmatprep.subr.bf16.mxu0 %v1730_v42 }
 0x31d   : > { %1733 = vmatpush1.bf16.msra.mxu0 %v1732_v45  ;;  %v1173_v45 = vld [vmem:[%s2212_s9 + $0x10] sm:$0xff] }
 0x31e   : > { %1735 = vmatprep.subr.bf16.mxu0 %v1734_v48  ;;  %v1746_v47 = vpack.c.bf16 %v1174_v46, %v1173_v45  ;;  %v1175_v48 = vld [vmem:[%s2212_s9 + $0x20] sm:$0xff] }
 0x31f   : > { %v1750_v50 = vpack.c.bf16 %v1176_v49, %v1175_v48  ;;  %v934_v45 = vld [vmem:[%s2214_s11 + $0x5] ss:$0 sm:$0xff] }
 0x321   : > { %1737 = vmatpush1.bf16.msra.mxu0 %v1736_v51  ;;  %v1177_v51 = vld [vmem:[%s2212_s9 + $0x30] sm:$0xff] }
 0x322   : > { %1739 = vmatprep.subr.bf16.mxu0 %v1738_v54  ;;  %v1754_v53 = vpack.c.bf16 %v1178_v52, %v1177_v51  ;;  %v1179_v54 = vld [vmem:[%s2212_s9 + $0x40] sm:$0xff] }
 0x323   : > { %v1758_v56 = vpack.c.bf16 %v1180_v55, %v1179_v54 }
 0x325   : > { %1741 = vmatpush1.bf16.msra.mxu0 %v1740_v57  ;;  %v1181_v57 = vld [vmem:[%s2212_s9 + $0x50] sm:$0xff] }
 0x3eb   : > { %v1605_v23 = vpop.f32.mrb[2].mxu0 }
 0x3ec   : > { %v818_v24 = vadd.f32 %v1605_v23, %v1490_v22  ;;  %v812_v25 = vpop.f32.mrb[3].mxu0  ;;  %v1047_v23 = vlaneseq }
 0x3ed   : > { %v813_v26 = vadd.f32 %v1490_v22, %v812_v25 }
 0x3ee   : > { %v822_v30 = vmax.f32 %v818_v24, 0.0  ;;  %v2083_v24 = vshrl.u32 %v1047_v23, 7 }
 0x3ef   : > { %v821_v29 = vmax.f32 %v813_v26, 0.0  ;;  %v2089_v26 = vld [vmem:[%s2214_s11 + $0x1] ss:$8 sm:$0x3] }
 0x3f0   : > { %v1049_v25 = vsub.s32 0, %v2083_v24 }
 0x3f1   : > { %1614 = vmatprep.mubr.msk.f32.mxu1 %vm594_vm1, %v821_v29 }
 0x3f2   : > { %1615 = vmatmul.mubr.msk.f32.vlgmr.msra.gmra.mrb[2].mxu1 %vm594_vm1, %v822_v30  ;;  %v1050_v27 = vrot.slane %v2089_v26, %v1049_v25 }
 0x3f3   : > { %1721 = vmatpush3.bf16.msra.mxu1 %v1718_v21  ;;  %1625 = vmatprep.mubr.msk.f32.mxu1 %vm594_vm1, %v926_v32 }
 0x3f4   : > { %1723 = vmatprep.subr.bf16.mxu1 %v1722_v31 }
 0x3f7   : > { %1725 = vmatpush3.bf16.msra.mxu1 %v1722_v31 }
 0x3f8   : > { %1743 = vmatprep.subr.bf16.mxu1 %v1742_v36 }
 0x3fa   : > { %1626 = vmatmul.mubr.msk.f32.vlgmr.msra.gmra.mrb[4].mxu1 %vm594_vm1, %v927_v33 }
 0x3fb   : > { %1745 = vmatpush3.bf16.msra.mxu1 %v1742_v36 }
 0x3fc   : > { %1747 = vmatprep.subr.bf16.mxu1 %v1746_v47 }
 0x3ff   : > { %1749 = vmatpush3.bf16.msra.mxu1 %v1746_v47 }
 0x400   : > { %1751 = vmatprep.subr.bf16.mxu1 %v1750_v50 }
 0x403   : > { %1753 = vmatpush3.bf16.msra.mxu1 %v1750_v50 }
 0x404   : > { %1755 = vmatprep.subr.bf16.mxu1 %v1754_v53 }
 0x407   : > { %1757 = vmatpush3.bf16.msra.mxu1 %v1754_v53 }
 0x408   : > { %1759 = vmatprep.subr.bf16.mxu1 %v1758_v56 }
 0x40b   : > { %1761 = vmatpush3.bf16.msra.mxu1 %v1758_v56 }
 0x4c5   : > { %v1616_v60 = vpop.f32.mrb[2].mxu1 }
 0x4c6   : > { %v909_v61 = vadd.f32 %v1616_v60, %v1493_v59  ;;  %v903_v62 = vpop.f32.mrb[3].mxu1  ;;  %v1183_v60 = vld [vmem:[%s2212_s9 + $0x60] sm:$0xff] }
 0x4c7   : > { %v904_v63 = vadd.f32 %v1493_v59, %v903_v62 }
 0x4c8   : > { %v1497_v0 = vmul.f32 -1.442695, %v909_v61  ;;  %v1184_v61 = vld [vmem:[%s2212_s9 + $0x68] sm:$0xff] }
 0x4c9   : > { %v1496_v1 = vmul.f32 -1.442695, %v904_v63  ;;  %v1766_v62 = vpack.c.bf16 %v1184_v61, %v1183_v60  ;;  %v1185_v63 = vld [vmem:[%s2212_s9 + $0x70] sm:$0xff] }
 0x4ca   : > { %1808 = vpow2.f32 %v1497_v0  ;;  %v1186_v0 = vld [vmem:[%s2212_s9 + $0x78] sm:$0xff] }
 0x4cb   : > { %1810 = vpow2.f32 %v1496_v1  ;;  %v1770_v1 = vpack.c.bf16 %v1186_v0, %v1185_v63 }
 0x4cd   : > { %v1627_v3 = vpop.f32.mrb[4].mxu1 }
 0x4ce   : > { %v1017_v4 = vadd.f32 %v1627_v3, %v928_v2  ;;  %v1011_v5 = vpop.f32.mrb[5].mxu1  ;;  %v1265_v3 = vld [vmem:[%s2213_s10 + $0x8] sm:$0xff] }
 0x4cf   : > { %v1012_v6 = vadd.f32 %v1011_v5, %v928_v2  ;;  %v1264_v2 = vld [vmem:[%s2213_s10] sm:$0xff] }
 0x4d0   : > { %v1023_v7 = vmul.f32 0.70710677, %v1017_v4  ;;  %v1021_v20 = vmul.f32 0.5, %v1017_v4  ;;  %v1266_v4 = vld [vmem:[%s2213_s10 + $0x10] sm:$0xff]  ;;  %v1774_v5 = vpack.c.bf16 %v1265_v3, %v1264_v2 }
 0x4d1   : > { %v1022_v8 = vmul.f32 0.70710677, %v1012_v6  ;;  %v1020_v15 = vmul.f32 0.5, %v1012_v6  ;;  %v1267_v6 = vld [vmem:[%s2213_s10 + $0x18] sm:$0xff] }
 0x4d2   : > { %1812 = verf.f32 %v1023_v7  ;;  %v1778_v7 = vpack.c.bf16 %v1267_v6, %v1266_v4  ;;  %1775 = vmatprep.subr.bf16.mxu0 %v1774_v5 }
 0x4d3   : > { %1814 = verf.f32 %v1022_v8  ;;  %v1268_v8 = vld [vmem:[%s2213_s10 + $0x20] sm:$0xff] }
 0x4d4   : > { %v1809_v9 = vpop.eup %1808 }
 0x4d5   : > { %v1811_v10 = vpop.eup %1810  ;;  %v919_v11 = vadd.f32 1.0, %v1809_v9  ;;  %v1269_v9 = vld [vmem:[%s2213_s10 + $0x28] sm:$0xff] }
 0x4d6   : > { %v918_v12 = vadd.f32 1.0, %v1811_v10  ;;  %v1782_v10 = vpack.c.bf16 %v1269_v9, %v1268_v8 }
 0x4d8   : > { %1816 = vrcp.f32 %v918_v12 }
 0x4d9   : > { %1818 = vrcp.f32 %v919_v11 }
 0x4dc   : > { %v1813_v13 = vpop.eup %1812 }
 0x4dd   : > { %v1815_v14 = vpop.eup %1814  ;;  %v1027_v17 = vadd.f32 1.0, %v1813_v13 }
 0x4de   : > { %v1026_v16 = vadd.f32 1.0, %v1815_v14 }
 0x4df   : > { %v1029_v22 = vmul.f32 %v1027_v17, %v1021_v20  ;;  %v1053_v17 = vsub.s32 1, %v2083_v24 }
 0x4e0   : > { %v1028_v18 = vmul.f32 %v1026_v16, %v1020_v15 }
 0x4e1   : > { %v1054_v20 = vrot.slane %v2089_v26, %v1053_v17 }
 0x4e2   : > { %v1817_v19 = vpop.eup %1816  ;;  %1501 = vmatmul.mubr.msk.f32.vlgmr.msra.gmra.mrb[4].mxu0 %vm676_vm2, %v1028_v18 }
 0x4e3   : > { %v1819_v21 = vpop.eup %1818  ;;  %924 = vst [vmem:[%s472_s21] sm:$0xff] %v1817_v19  ;;  %1133 = vmatprep.mubr.f32.mxu0 %v1841_v58  ;;  %v1182_v58 = vld [vmem:[%s2212_s9 + $0x58] sm:$0xff]  ;;  %1777 = vmatpush3.bf16.msra.mxu0 %v1774_v5  ;;  %v931_v19 = vld [vmem:[%s2214_s11 + $0x2] ss:$0 sm:$0xff] }
 0x4e4   : > { %925 = vst [vmem:[%s472_s21 + $0x8] sm:$0xff] %v1819_v21  ;;  %v1762_v59 = vpack.c.bf16 %v1182_v58, %v1181_v57  ;;  %1779 = vmatprep.subr.bf16.mxu0 %v1778_v7 }
 0x4e6   : > { %1502 = vmatmul.mubr.msk.f32.gmra.mrb[6].mxu0 %vm676_vm2, %v1029_v22  ;;  %1763 = vmatprep.subr.bf16.mxu1 %v1762_v59  ;;  %v932_v22 = vld [vmem:[%s2214_s11 + $0x3] ss:$0 sm:$0xff] }
 0x4e7   : > { %1765 = vmatpush3.bf16.msra.mxu1 %v1762_v59  ;;  %1781 = vmatpush3.bf16.msra.mxu0 %v1778_v7 }
 0x4e8   : > { %1767 = vmatprep.subr.bf16.mxu1 %v1766_v62  ;;  %1783 = vmatprep.subr.bf16.mxu0 %v1782_v10 }
 0x4eb   : > { %1769 = vmatpush3.bf16.msra.mxu1 %v1766_v62  ;;  %1785 = vmatpush3.bf16.msra.mxu0 %v1782_v10 }
 0x4ec   : > { %1771 = vmatprep.subr.bf16.mxu1 %v1770_v1 }
 0x4ef   : > { %1773 = vmatpush3.bf16.msra.mxu1 %v1770_v1 }
 0x5b5   : > { %v1129_v28 = vpop.f32.mrb[4].mxu0 }
 0x5b6   : > { %v1130_v29 = vadd.f32 %v1129_v28, %v1050_v27  ;;  %v2092_v30 = vpop.f32.mrb[5].mxu0 }
 0x5b8   : > { %1140 = vadd.xlane.f32.xlu1 %v1130_v29 }
 0x5b9   : > { %v1135_v31 = vpop.f32.mrb[6].mxu0 }
 0x5ba   : > { %v1136_v32 = vadd.f32 %v1135_v31, %v1050_v27  ;;  %v2094_v33 = vpop.f32.mrb[7].mxu0  ;;  %v1132_v27 = vadd.f32 %v2092_v30, %v1054_v20  ;;  %v1271_v30 = vld [vmem:[%s2213_s10 + $0x38] sm:$0xff] }
 0x5bc   : > { %1142 = vadd.xlane.f32.xlu0 %v1136_v32 }
 0x645   : > { %v1141_v37 = vpop.xlane.xlu1 %1140 }
 0x646   : > { %v1145_v38 = vmul.f32 0.0078125, %v1141_v37  ;;  %v1270_v37 = vld [vmem:[%s2213_s10 + $0x30] sm:$0xff] }
 0x648   : > { %v2102_v39 = vsub.f32 %v1130_v29, %v1145_v38  ;;  %v1786_v38 = vpack.c.bf16 %v1271_v30, %v1270_v37 }
 0x649   : > { %v1143_v40 = vpop.xlane.xlu0 %1142 }
 0x64a   : > { %v1146_v41 = vmul.f32 0.0078125, %v1143_v40  ;;  %v1149_v42 = vmul.f32 %v2102_v39, %v2102_v39  ;;  %1787 = vmatprep.subr.bf16.mxu0 %v1786_v38 }
 0x64b   : > { %1789 = vmatpush3.bf16.msra.mxu0 %v1786_v38 }
 0x64c   : > { %v2106_v43 = vsub.f32 %v1136_v32, %v1146_v41  ;;  %1151 = vadd.xlane.f32.xlu0 %v1149_v42  ;;  %v1138_v32 = vadd.f32 %v2094_v33, %v1054_v20  ;;  %v933_v33 = vld [vmem:[%s2214_s11 + $0x4] ss:$0 sm:$0xff] }
 0x64e   : > { %v1150_v44 = vmul.f32 %v2106_v43, %v2106_v43 }
 0x650   : > { %1153 = vadd.xlane.f32.xlu1 %v1150_v44 }
 0x6d9   : > { %v1152_v11 = vpop.xlane.xlu0 %1151 }
 0x6da   : > { %v1155_v12 = vmul.f32 0.0078125, %v1152_v11 }
 0x6dc   : > { %v1157_v13 = vadd.f32 1e-05, %v1155_v12 }
 0x6dd   : > { %v1154_v14 = vpop.xlane.xlu1 %1153 }
 0x6de   : > { %1820 = vrsqrt.f32 %v1157_v13  ;;  %v1156_v15 = vmul.f32 0.0078125, %v1154_v14 }
 0x6e0   : > { %v1158_v16 = vadd.f32 1e-05, %v1156_v15 }
 0x6e2   : > { %1822 = vrsqrt.f32 %v1158_v16 }
 0x6e8   : > { %v1821_v18 = vpop.eup %1820 }
 0x6e9   : > { %v1161_v21 = vmul.f32 %v1821_v18, %v2102_v39 }
 0x6eb   : > { %v1163_v23 = vmul.f32 %v1161_v21, %v931_v19 }
 0x6ec   : > { %v1823_v25 = vpop.eup %1822 }
 0x6ed   : > { %v1162_v28 = vmul.f32 %v1823_v25, %v2106_v43  ;;  %v1165_v24 = vadd.f32 %v1163_v23, %v932_v22 }
 0x6ef   : > { %v1164_v29 = vmul.f32 %v1162_v28, %v931_v19  ;;  %v1167_v31 = vadd.f32 %v1165_v24, %v1132_v27 }
 0x6f1   : > { %v1166_v34 = vadd.f32 %v1164_v29, %v932_v22  ;;  %v1169_v35 = vmax.f32 %v1167_v31, 0.0 }
 0x6f3   : > { %1660 = vmatprep.mubr.f32.mxu1 %v1169_v35  ;;  %v1168_v26 = vadd.f32 %v1166_v34, %v1138_v32 }
 0x6f5   : > { %v1170_v36 = vmax.f32 %v1168_v26, 0.0 }
 0x6f7   : > { %1661 = vmatmul.mubr.f32.vlgmr.msra.gmra.mrb[6].mxu1 %v1170_v36 }
 0x7ca   : > { %v1662_v39 = vpop.f32.mrb[6].mxu1 }
 0x7cb   : > { %v1259_v40 = vadd.f32 %v1662_v39, %v933_v33  ;;  %v1253_v41 = vpop.f32.mrb[7].mxu1 }
 0x7cc   : > { %v1254_v42 = vadd.f32 %v1253_v41, %v933_v33 }
 0x7cd   : > { %v1263_v44 = vmax.f32 %v1259_v40, 0.0 }
 0x7ce   : > { %v1262_v43 = vmax.f32 %v1254_v42, 0.0 }
 0x7d0   : > { %1679 = vmatprep.mubr.msk.f32.mxu0 %vm676_vm2, %v1262_v43 }
 0x7d1   : > { %1680 = vmatmul.mubr.msk.f32.vlgmr.msra.gmra.mrb[8].mxu0 %vm676_vm2, %v1263_v44 }
 0x8a4   : > { %v1681_v46 = vpop.f32.mrb[8].mxu0 }
 0x8a5   : > { %v1350_v47 = vadd.f32 %v1681_v46, %v934_v45  ;;  %v1344_v48 = vpop.f32.mrb[9].mxu0 }
 0x8a6   : > { %v1345_v49 = vadd.f32 %v1344_v48, %v934_v45 }
 0x8a7   : > { %v1506_v50 = vmul.f32 -1.442695, %v1350_v47 }
 0x8a8   : > { %v1505_v51 = vmul.f32 -1.442695, %v1345_v49 }
 0x8a9   : > { %1824 = vpow2.f32 %v1506_v50 }
 0x8aa   : > { %1826 = vpow2.f32 %v1505_v51 }
 0x8b3   : > { %v1825_v52 = vpop.eup %1824 }
 0x8b4   : > { %v1827_v53 = vpop.eup %1826  ;;  %v1360_v54 = vadd.f32 1.0, %v1825_v52 }
 0x8b5   : > { %v1359_v55 = vadd.f32 1.0, %v1827_v53 }
 0x8b7   : > { %1828 = vrcp.f32 %v1359_v55 }
 0x8b8   : > { %1830 = vrcp.f32 %v1360_v54 }
 0x8c1   : > { %v1829_v56 = vpop.eup %1828 }
 0x8c2   : > { %v1831_v57 = vpop.eup %1830  ;;  %1365 = vst [vmem:[%s478_s22] sm:$0xff] %v1829_v56 }
 0x8c3   : > { %1366 = vst [vmem:[%s478_s22 + $0x8] sm:$0xff] %v1831_v57 }
 0x8c4 PF: > { %s24_s25 = sadd.s32 1, %s1838_s25  }
 0x8c5   : > { %p21_p4 = scmp.ge.s32.totalorder %s24_s25, 4  }
 0x8c7   :  { %23 = sbr.rel (!%p21_p4) target bundleno = 1 (0x1), region = 114 }

</bundles_post_ra>
